<compile_context>
chip_gen: v7x
topology: tpu7x:2x2x1
jax: 0.10.0
libtpu: 0.0.40
codegen_flags: <defaults>
</compile_context>

<pallas_src>
import functools

import jax
import jax.numpy as jnp
from jax.experimental import pallas as pl
from jax.experimental.pallas import tpu as pltpu

_LN_EPS = 1e-5  # torch.nn.LayerNorm default


def _make_kernel(n_rows, tile_rows, hidden, nonlinearity_loss):
    inv_h = 1.0 / float(hidden)

    def kernel(x_ref, out_ref):
        x = x_ref[...].astype(jnp.float32)                       # (tile_rows, hidden)

        # Single-pass row moments.
        s1 = jnp.sum(x, axis=-1, keepdims=True)                  # (tile_rows, 1)
        s2 = jnp.sum(x * x, axis=-1, keepdims=True)              # (tile_rows, 1)
        mu = s1 * inv_h
        var = jnp.maximum(s2 * inv_h - mu * mu, 0.0)             # biased (LN) variance

        if nonlinearity_loss:
            d = var - 1.0
            row_term = d * d                                     # (var - 1)^2 per row
        else:
            # mean((x - LayerNorm(x))^2) per row == mu^2 + (1 - r)^2 * var
            r = jax.lax.rsqrt(var + _LN_EPS)
            one_minus_r = 1.0 - r
            row_term = mu * mu + one_minus_r * one_minus_r * var

        # Mask rows past the true batch size (ragged last block is padded).
        rows = jax.lax.broadcasted_iota(jnp.int32, row_term.shape, 0)
        valid = (pl.program_id(0) * tile_rows + rows) < n_rows
        row_term = jnp.where(valid, row_term, 0.0)

        # Lane-dense per-block partial sum (unmasked vst); wrapper reads [0, 0].
        block_sum = jnp.sum(row_term)
        out_ref[...] = jnp.full(out_ref.shape, block_sum, dtype=jnp.float32)

    return kernel


def _pick_tile_rows(n, h, itemsize, block_rows=None):
    """Rows per block: ~4 MiB/buffer target (double-buffered -> ~8 MiB VMEM)."""
    if block_rows is not None:
        tn = int(block_rows)
    else:
        max_rows_by_vmem = max(8, (4 * 1024 * 1024) // max(1, h * itemsize))
        tn = min(n, 1024, max_rows_by_vmem)
    if tn >= n:
        return n                     # full batch in one block (always legal)
    # When actually tiling, respect sublane granularity (8 for f32, 16 for bf16).
    gran = 16 if itemsize == 2 else 8
    return max(gran, (tn // gran) * gran)


def local_loss_mean(x, lambda_mean=1.0, lambda_var=1.0, nonlinearity_loss=False,
                    block_rows=None):
    """Pallas implementation of LocalLossMean.forward. Returns a scalar f32."""
    del lambda_var  # unused by the reference forward
    n, h = x.shape
    tn = _pick_tile_rows(n, h, jnp.dtype(x.dtype).itemsize, block_rows)
    num_blocks = -(-n // tn)

    kernel = _make_kernel(n, tn, h, nonlinearity_loss)

    partials = pl.pallas_call(
        kernel,
        out_shape=jax.ShapeDtypeStruct((num_blocks, 8, 128), jnp.float32),
        grid=(num_blocks,),
        in_specs=[pl.BlockSpec((tn, h), lambda i: (i, 0))],
        out_specs=pl.BlockSpec((1, 8, 128), lambda i: (i, 0, 0)),
        compiler_params=pltpu.CompilerParams(
            dimension_semantics=("parallel",),        # megacore-shardable on v7x
            vmem_limit_bytes=32 * 1024 * 1024,
        ),
        cost_estimate=pl.CostEstimate(
            flops=5 * n * h,
            transcendentals=n,                        # one rsqrt per row
            bytes_accessed=n * h * jnp.dtype(x.dtype).itemsize
            + num_blocks * 8 * 128 * 4,
        ),
    )(x)

    # Finalize once: sum of per-row losses / n, scaled by lambda.
    total = jnp.sum(partials[:, 0, 0])
    return (jnp.float32(lambda_mean) * total) / jnp.float32(n)


def _reference(x, lambda_mean=1.0, nonlinearity_loss=False):
    """Pure-JAX reference mirroring the PyTorch module (two-pass LN stats)."""
    x = x.astype(jnp.float32)
    mu = jnp.mean(x, axis=-1, keepdims=True)
    var = jnp.mean((x - mu) ** 2, axis=-1, keepdims=True)
    if not nonlinearity_loss:
        y = (x - mu) / jnp.sqrt(var + _LN_EPS)
        return lambda_mean * jnp.mean((x - y) ** 2)
    return lambda_mean * jnp.mean((var - 1.0) ** 2)


if __name__ == "__main__":
    key = jax.random.PRNGKey(0)

    # --- Primary case: LayerNorm(hidden_size); inputs are (batch, hidden) ---
    batch, hidden = 8, 32
    x = jax.random.normal(key, (batch, hidden), dtype=jnp.float32) * 2.0 + 0.5

    loss = jax.block_until_ready(
        local_loss_mean(x, lambda_mean=1.0, nonlinearity_loss=False))
    ref = _reference(x, lambda_mean=1.0, nonlinearity_loss=False)
    assert jnp.allclose(loss, ref, rtol=1e-4, atol=1e-6), (loss, ref)

    loss2 = jax.block_until_ready(
        local_loss_mean(x, lambda_mean=1.0, nonlinearity_loss=True))
    ref2 = _reference(x, lambda_mean=1.0, nonlinearity_loss=True)
    assert jnp.allclose(loss2, ref2, rtol=1e-4, atol=1e-6), (loss2, ref2)

    # --- Exercise the tiled / ragged / parallel path with a modest shape ---
    key2 = jax.random.PRNGKey(1)
    xb = jax.random.normal(key2, (520, 128), dtype=jnp.float32) * 1.5 - 0.25
    loss3 = jax.block_until_ready(
        local_loss_mean(xb, lambda_mean=0.7, nonlinearity_loss=False, block_rows=64))
    ref3 = _reference(xb, lambda_mean=0.7, nonlinearity_loss=False)
    assert jnp.allclose(loss3, ref3, rtol=1e-4, atol=1e-6), (loss3, ref3)

    loss4 = jax.block_until_ready(
        local_loss_mean(xb, lambda_mean=0.7, nonlinearity_loss=True, block_rows=64))
    ref4 = _reference(xb, lambda_mean=0.7, nonlinearity_loss=True)
    assert jnp.allclose(loss4, ref4, rtol=1e-4, atol=1e-6), (loss4, ref4)

    print("KERNEL_OK")
</pallas_src>

<mosaic_0001>
module attributes {stable_mosaic.version = 11 : i64} {
  func.func @kernel(%arg0: i32, %arg1: memref<8x32xf32, #tpu.memory_space<vmem>>, %arg2: memref<1x8x128xf32, #tpu.memory_space<vmem>>) attributes {dimension_semantics = [#tpu.dimension_semantics<parallel>], iteration_bounds = array<i64: 1>, scalar_prefetch = 0 : i64, scratch_operands = 0 : i64, tpu.core_type = #tpu.core_type<tc>, window_params = [{transform_indices = @transform_0, window_bounds = array<i64: 8, 32>}, {transform_indices = @transform_1, window_bounds = array<i64: 1, 8, 128>}]} {
    %c0 = arith.constant 0 : index
    %c0_0 = arith.constant 0 : index
    %0 = vector.load %arg1[%c0, %c0_0] : memref<8x32xf32, #tpu.memory_space<vmem>>, vector<8x32xf32>
    %cst = arith.constant dense<0.000000e+00> : vector<8xf32>
    %1 = vector.multi_reduction <add>, %0, %cst [1] : vector<8x32xf32> to vector<8xf32>
    %2 = vector.shape_cast %1 : vector<8xf32> to vector<8x1xf32>
    %3 = arith.mulf %0, %0 : vector<8x32xf32>
    %cst_1 = arith.constant dense<0.000000e+00> : vector<8xf32>
    %4 = vector.multi_reduction <add>, %3, %cst_1 [1] : vector<8x32xf32> to vector<8xf32>
    %5 = vector.shape_cast %4 : vector<8xf32> to vector<8x1xf32>
    %cst_2 = arith.constant 3.125000e-02 : f32
    %6 = vector.broadcast %cst_2 : f32 to vector<8x1xf32>
    %7 = arith.mulf %2, %6 : vector<8x1xf32>
    %cst_3 = arith.constant 3.125000e-02 : f32
    %8 = vector.broadcast %cst_3 : f32 to vector<8x1xf32>
    %9 = arith.mulf %5, %8 : vector<8x1xf32>
    %10 = arith.mulf %7, %7 : vector<8x1xf32>
    %11 = arith.subf %9, %10 : vector<8x1xf32>
    %cst_4 = arith.constant 0.000000e+00 : f32
    %12 = vector.broadcast %cst_4 : f32 to vector<8x1xf32>
    %13 = arith.maximumf %11, %12 : vector<8x1xf32>
    %cst_5 = arith.constant 9.99999974E-6 : f32
    %14 = vector.broadcast %cst_5 : f32 to vector<8x1xf32>
    %15 = arith.addf %13, %14 : vector<8x1xf32>
    %16 = math.rsqrt %15 : vector<8x1xf32>
    %cst_6 = arith.constant 1.000000e+00 : f32
    %17 = vector.broadcast %cst_6 : f32 to vector<8x1xf32>
    %18 = arith.subf %17, %16 : vector<8x1xf32>
    %19 = arith.mulf %7, %7 : vector<8x1xf32>
    %20 = arith.mulf %18, %18 : vector<8x1xf32>
    %21 = arith.mulf %20, %13 : vector<8x1xf32>
    %22 = arith.addf %19, %21 : vector<8x1xf32>
    %23 = tpu.iota {dimensions = array<i32: 0>} : vector<8x1xi32>
    %c8_i32 = arith.constant 8 : i32
    %24 = arith.muli %arg0, %c8_i32 : i32
    %25 = vector.broadcast %24 : i32 to vector<8x1xi32>
    %26 = arith.addi %25, %23 : vector<8x1xi32>
    %c8_i32_7 = arith.constant 8 : i32
    %27 = vector.broadcast %c8_i32_7 : i32 to vector<8x1xi32>
    %28 = arith.cmpi slt, %26, %27 : vector<8x1xi32>
    %cst_8 = arith.constant 0.000000e+00 : f32
    %29 = vector.broadcast %cst_8 : f32 to vector<8x1xf32>
    %30 = arith.select %28, %22, %29 : vector<8x1xi1>, vector<8x1xf32>
    %31 = vector.shape_cast %30 : vector<8x1xf32> to vector<1x8x1xf32>
    %cst_9 = arith.constant dense<0.000000e+00> : vector<1xf32>
    %32 = vector.multi_reduction <add>, %31, %cst_9 [1, 2] : vector<1x8x1xf32> to vector<1xf32>
    %33 = vector.shape_cast %32 : vector<1xf32> to vector<1x1x1xf32>
    %34 = vector.extract %33[0, 0, 0] : f32 from vector<1x1x1xf32>
    %35 = vector.broadcast %34 : f32 to vector<1x8x128xf32>
    %c0_10 = arith.constant 0 : index
    %c0_11 = arith.constant 0 : index
    %c0_12 = arith.constant 0 : index
    %36 = vector.load %arg2[%c0_10, %c0_11, %c0_12] : memref<1x8x128xf32, #tpu.memory_space<vmem>>, vector<1x8x128xf32>
    tpu.vector_store %arg2[%c0_10, %c0_11, %c0_12], %35 {strides = array<i32>} : memref<1x8x128xf32, #tpu.memory_space<vmem>>, vector<1x8x128xf32>,
    return
  }
  func.func @transform_0(%arg0: i32) -> (i32, i32) {
    %c0_i32 = arith.constant 0 : i32
    %c0_i32_0 = arith.constant 0 : i32
    return %arg0, %c0_i32 : i32, i32
  }
  func.func @transform_1(%arg0: i32) -> (i32, i32, i32) {
    %c0_i32 = arith.constant 0 : i32
    %c0_i32_0 = arith.constant 0 : i32
    %c0_i32_1 = arith.constant 0 : i32
    return %arg0, %c0_i32, %c0_i32_0 : i32, i32, i32
  }
}

</mosaic_0001>

<bundles_post_ra>
// kernel: tpu_custom_call.1
= control target key start
LH: loop header
LB: loop body
LE: loop exit
PB: predicated region body
PF: predicated region fallthrough
CT: control target
= control target key end

     0   :  { %6 = vsyncpa [#allocation3], 0  ;;  %s166_s0 = inlined_call_operand.hbm [shape: f32[8,32], index: 0, kind: input, shape index: {}]   ;;  %s167_s1 = inlined_call_operand.hbm [shape: f32[1,8,128], index: 1, kind: output, shape index: {}]  }
   0x1   :  { %7 = vsyncpa [#allocation4], 0  ;;  %s130_s6 = smov [#allocation2]   ;;  %s82_s10 = scalar_lea.hbm %s166_s0, 128 }
   0x2   :  { %s14_s7 = sshll.u32 %s130_s6, 4  ;;  %p83_p0 = scmp.ne.s32.totalorder %s166_s0, %s82_s10  ;;  %s15_s7 = int_to_ptr.vmem [resolvable:$true] %s14_s7 }
   0x3   :  { %p86_p1 = scmp.lt.u32.totalorder %s82_s10, %s166_s0 }
   0x5   :  { %p88_p2 = pnand %p86_p1, %p83_p0 }
   0x7   :  { %91 = shalt.err (!%p88_p2)
}
   0x8   :  { %s92_s15 = scalar_lea.vmem %s15_s7, 128  ;;  %p97_p4 = scmp.lt.s32.totalorder %s15_s7, %s15_s7 }
   0x9   :  { %p93_p3 = scmp.ne.s32.totalorder %s15_s7, %s92_s15  ;;  %p98_p5 = scmp.lt.s32.totalorder %s92_s15, %s92_s15 }
   0xb   :  { %p99_p6 = por %p98_p5, %p97_p4 }
   0xd   :  { %p100_p7 = pnand %p99_p6, %p93_p3 }
   0xf   :  { %103 = shalt.err (!%p100_p7)
}
  0x10   :  { %17 = dma.hbm_to_vmem [thread:$0]  %s166_s0, 128, %s15_s7, [#allocation3]  }
  0x11   :  { %126 = dma.done.wait [#allocation3], 128  }
  0x12   :  { %127 = vsyncadd [#allocation3], 4294967168  ;;  %vm22_vm0 = vcmask 261120   ;;  %v21_v0 = vld [vmem:[#allocation2] sm:$0xff]  ;;  %vm48_vm1 = vcmask 7168   ;;  %s131_s0 = smov [#allocation5]  }
  0x13   :  { %v23_v1 = vsel %vm22_vm0, %v21_v0, 0.0  ;;  %v26_v2 = vmul.f32 %v21_v0, %v21_v0  ;;  %s67_s18 = sshll.u32 %s131_s0, 4  ;;  %s68_s18 = int_to_ptr.vmem [resolvable:$true] %s67_s18 }
  0x14   :  { %24 = vadd.xlane.f32.xlu0 %v23_v1  ;;  %s104_s20 = scalar_lea.vmem %s68_s18, 128  ;;  %p109_p9 = scmp.lt.s32.totalorder %s68_s18, %s68_s18 }
  0x15   :  { %v27_v3 = vsel %vm22_vm0, %v26_v2, 0.0  ;;  %p105_p8 = scmp.ne.s32.totalorder %s68_s18, %s104_s20  ;;  %p110_p10 = scmp.lt.s32.totalorder %s104_s20, %s104_s20 }
  0x17   :  { %p111_p11 = por %p110_p10, %p109_p9 }
  0x18   :  { %28 = vadd.xlane.f32.xlu0 %v27_v3 }
  0x19   :  { %p112_p12 = pnand %p111_p11, %p105_p8 }
  0xa1   :  { %v25_v4 = vpop.xlane.xlu0 %24 }
  0xa2   :  { %v30_v5 = vmul.f32 0.03125, %v25_v4 }
  0xa4   :  { %v32_v7 = vmul.f32 %v30_v5, %v30_v5 }
  0xa5   :  { %v29_v6 = vpop.xlane.xlu0 %28 }
  0xa6   :  { %v31_v8 = vmul.f32 0.03125, %v29_v6 }
  0xa8   :  { %v33_v9 = vsub.f32 %v31_v8, %v32_v7 }
  0xaa   :  { %v34_v10 = vmax.f32 %v33_v9, 0.0 }
  0xac   :  { %v35_v11 = vadd.f32 1e-05, %v34_v10 }
  0xae   :  { %80 = vrsqrt.f32 %v35_v11 }
  0xb8   :  { %v81_v12 = vpop.eup %80 }
  0xb9   :  { %v37_v13 = vsub.f32 1.0, %v81_v12 }
  0xbb   :  { %v38_v14 = vmul.f32 %v37_v13, %v37_v13 }
  0xbd   :  { %v39_v15 = vmul.f32 %v38_v14, %v34_v10 }
  0xbf   :  { %v40_v16 = vadd.f32 %v39_v15, %v32_v7 }
  0xc1   :  { %v49_v17 = vsel %vm48_vm1, %v40_v16, 0.0 }
  0xc2   :  { %50 = vadd.xlane.f32.xlu1 %v49_v17 }
 0x14f   :  { %v51_v18 = vpop.xlane.xlu1 %50 }
 0x150   :  { %v52_v19 = vrot.slane %v51_v18, 4 }
 0x152   :  { %v53_v20 = vadd.f32 %v52_v19, %v51_v18 }
 0x154   :  { %v54_v21 = vrot.slane %v53_v20, 2 }
 0x156   :  { %v55_v22 = vadd.f32 %v54_v21, %v53_v20 }
 0x158   :  { %v56_v23 = vrot.slane %v55_v22, 1 }
 0x15a   :  { %v57_v24 = vadd.f32 %v56_v23, %v55_v22 }
 0x15c   :  { %76 = vpush %v57_v24 }
 0x18d   :  { %s77_s19 = spop %76 }
 0x18e   :  { %v59_v25 = vstv %s77_s19 }
 0x18f   :  { %60 = vst [vmem:[#allocation5] sm:$0xff] %v59_v25 }
 0x190   :  { %115 = shalt.err (!%p112_p12)
}
 0x191   :  { %s116_s23 = scalar_lea.hbm %s167_s1, 128 }
 0x192   :  { %p117_p13 = scmp.ne.s32.totalorder %s167_s1, %s116_s23  ;;  %p120_p0 = scmp.lt.u32.totalorder %s116_s23, %s167_s1 }
 0x194   :  { %p122_p1 = pnand %p120_p0, %p117_p13 }
 0x196   :  { %125 = shalt.err (!%p122_p1)
}
 0x197   :  { %70 = dma.vmem_to_hbm [thread:$0]  %s68_s18, 128, %s167_s1, [#allocation4]  }
 0x198   :  { %128 = dma.done.wait [#allocation4], 128  }
 0x199   :  { %129 = vsyncadd [#allocation4], 4294967168 }
 0x19a   :  { %74 = vsyncpa [#allocation3], 1 }
 0x19b   :  { %75 = vsyncpa [#allocation4], 1 }

</bundles_post_ra>
